<compile_context>
chip_gen: v7x
topology: tpu7x:2x2x1
jax: 0.10.0
libtpu: 0.0.40
codegen_flags: <defaults>
</compile_context>

<pallas_src>
import math
import jax
import jax.numpy as jnp
from jax.experimental import pallas as pl
from jax.experimental.pallas import tpu as pltpu


# --------------------------------------------------------------------------
# Kernel body
# --------------------------------------------------------------------------
def _ffn_kernel(x_ref, w1_ref, b1_ref, w2_ref, b2_ref, o_ref, acc_ref):
    # x_ref : (TM, E)    w1_ref: (E, TF)   b1_ref: (1, TF)
    # w2_ref: (TF, E)    b2_ref: (1, E)    o_ref : (TM, E)   acc_ref: (TM, E) f32
    j = pl.program_id(1)

    @pl.when(j == 0)
    def _():
        acc_ref[...] = jnp.zeros_like(acc_ref)

    # fc1 slice: (TM, E) @ (E, TF) -> (TM, TF), f32 accumulation on the MXU.
    h = jnp.dot(x_ref[...], w1_ref[...], preferred_element_type=jnp.float32)
    # bias + ReLU in f32 (VPU work, hidden under the matmuls).
    h = jnp.maximum(h + b1_ref[...], 0.0)
    # fc2 partial sum over this F slice: (TM, TF) @ (TF, E) -> (TM, E).
    acc_ref[...] += jnp.dot(h.astype(w2_ref.dtype), w2_ref[...],
                            preferred_element_type=jnp.float32)

    @pl.when(j == pl.num_programs(1) - 1)
    def _():
        o_ref[...] = (acc_ref[...] + b2_ref[...]).astype(o_ref.dtype)


# --------------------------------------------------------------------------
# Tiling / hardware helpers
# --------------------------------------------------------------------------
def _round_up(x, m):
    return ((x + m - 1) // m) * m


def _tpu_vmem_capacity():
    try:
        return int(pltpu.get_tpu_info().vmem_capacity_bytes)
    except Exception:
        return 64 << 20  # conservative (v7x-sized) fallback


def _num_tensorcores():
    # Best-effort query; attribute names differ across versions, default 1.
    try:
        info = pltpu.get_tpu_info()
    except Exception:
        return 1
    for attr in ("num_cores", "core_count", "num_tensorcores", "tensorcore_count"):
        v = getattr(info, attr, None)
        if isinstance(v, int) and v > 0:
            return v
    return 1


def _vmem_limit_bytes():
    cap = _tpu_vmem_capacity()
    if cap >= (128 << 20):
        return 100 << 20                 # v5e/v6e: use most of the 128 MiB
    return max(32 << 20, cap * 3 // 4)   # v7x: ~48 MiB of 64 MiB


def _choose_tm(m, sub_mult):
    """Row-tile size: big on 128-MiB chips, 256 on v7x, >=2 tiles if multi-TC."""
    target = 512 if _tpu_vmem_capacity() >= (128 << 20) else 256
    tm = max(sub_mult, min(target, _round_up(m, sub_mult)))
    # v7x has 2 TensorCores: a single-tile "parallel" axis idles one of them.
    if _num_tensorcores() > 1 and pl.cdiv(m, tm) < 2 and m >= 2 * sub_mult:
        tm = _round_up(pl.cdiv(m, 2), sub_mult)
    return tm


def _choose_tf(f, target=512):
    """Hidden-dim tile: whole F when small, else a 128-aligned 512 slice."""
    if f <= target:
        return f          # single F-tile; block last dim == full array dim
    return target         # multiple of 128 -> satisfies the (8,128) tile rule


# --------------------------------------------------------------------------
# Wrapper
# --------------------------------------------------------------------------
def fully_connected(x, w1, b1, w2, b2, *, compute_dtype=jnp.bfloat16,
                    tm=None, tf=None):
    """x: (..., E) -> (..., E). Whole FFN hot path runs inside one Pallas kernel.

    compute_dtype: matmul input dtype (default bf16 for full MXU rate on
    v5e/v6e/v7x); accumulation, bias add and ReLU are always f32.  Output
    keeps x.dtype.  Pass compute_dtype=jnp.float32 (or None) for exact f32.
    """
    orig_shape = x.shape
    out_dtype = x.dtype
    E = orig_shape[-1]
    F = w1.shape[1]

    in_dtype = jnp.dtype(compute_dtype if compute_dtype is not None else x.dtype)
    x2d = x.reshape(-1, E).astype(in_dtype)
    M = x2d.shape[0]

    # dtype-packed sublane multiple: 8 (f32), 16 (bf16), 32 (8-bit).
    sub_mult = {4: 8, 2: 16, 1: 32}.get(in_dtype.itemsize, 8)

    TM = tm if tm is not None else _choose_tm(M, sub_mult)
    TF = tf if tf is not None else _choose_tf(F)
    n_m = pl.cdiv(M, TM)
    n_f = pl.cdiv(F, TF)
    F_pad = n_f * TF

    w1c = w1.astype(in_dtype)
    w2c = w2.astype(in_dtype)
    b1_2d = b1.reshape(1, F).astype(jnp.float32)
    b2_2d = b2.reshape(1, E).astype(jnp.float32)
    if F_pad != F:
        # Zero-pad weights/bias along F only: padded hidden units are
        # relu(0 + 0) == 0 and contribute nothing through the zero W2 rows.
        w1c = jnp.pad(w1c, ((0, 0), (0, F_pad - F)))
        w2c = jnp.pad(w2c, ((0, F_pad - F), (0, 0)))
        b1_2d = jnp.pad(b1_2d, ((0, 0), (0, F_pad - F)))

    w_item = in_dtype.itemsize
    cost = pl.CostEstimate(
        flops=4 * M * E * F,                                   # two matmuls
        transcendentals=0,
        bytes_accessed=(M * E * w_item                         # activations in
                        + M * E * jnp.dtype(out_dtype).itemsize  # out
                        + n_m * 2 * E * F_pad * w_item         # weights re-streamed per M-tile
                        + (F_pad + E) * 4),                    # biases (f32)
    )

    out = pl.pallas_call(
        _ffn_kernel,
        out_shape=jax.ShapeDtypeStruct((M, E), out_dtype),
        grid_spec=pltpu.PrefetchScalarGridSpec(
            num_scalar_prefetch=0,
            grid=(n_m, n_f),                                   # M outer, F (reduction) inner
            in_specs=[
                pl.BlockSpec((TM, E), lambda i, j: (i, 0)),    # x: resident across F-tiles
                pl.BlockSpec((E, TF), lambda i, j: (0, j)),    # W1 F-slice (streamed)
                pl.BlockSpec((1, TF), lambda i, j: (0, j)),    # b1 F-slice
                pl.BlockSpec((TF, E), lambda i, j: (j, 0)),    # W2 F-slice (streamed)
                pl.BlockSpec((1, E), lambda i, j: (0, 0)),     # b2 (tiny, resident)
            ],
            out_specs=pl.BlockSpec((TM, E), lambda i, j: (i, 0)),
            scratch_shapes=[pltpu.VMEM((TM, E), jnp.float32)],  # fc2 accumulator
        ),
        compiler_params=pltpu.CompilerParams(
            dimension_semantics=("parallel", "arbitrary"),
            vmem_limit_bytes=_vmem_limit_bytes(),
        ),
        cost_estimate=cost,
    )(x2d, w1c, b1_2d, w2c, b2_2d)

    # TODO(synk): for decode-style tiny M with huge weights, an F-outer /
    # M-inner grid (weights resident, activations re-streamed) minimizes HBM
    # traffic; not needed at these shapes.
    return out.reshape(orig_shape)


# --------------------------------------------------------------------------
# Parameter init (mirrors nn.Linear's U(-1/sqrt(fan_in), 1/sqrt(fan_in)))
# --------------------------------------------------------------------------
def init_params(key, embedding_dim, fully_connected_dim, dtype=jnp.float32):
    k1, k2, k3, k4 = jax.random.split(key, 4)
    lim1 = 1.0 / math.sqrt(embedding_dim)
    lim2 = 1.0 / math.sqrt(fully_connected_dim)
    # Stored transposed vs. nn.Linear.weight: (in_features, out_features)
    w1 = jax.random.uniform(k1, (embedding_dim, fully_connected_dim),
                            dtype, minval=-lim1, maxval=lim1)
    b1 = jax.random.uniform(k2, (fully_connected_dim,), dtype,
                            minval=-lim1, maxval=lim1)
    w2 = jax.random.uniform(k3, (fully_connected_dim, embedding_dim),
                            dtype, minval=-lim2, maxval=lim2)
    b2 = jax.random.uniform(k4, (embedding_dim,), dtype,
                            minval=-lim2, maxval=lim2)
    return w1, b1, w2, b2


if __name__ == "__main__":
    key = jax.random.PRNGKey(0)
    kx, kp, kp2 = jax.random.split(key, 3)

    # Small shapes consistent with the module's forward: (batch, seq, E) -> same.
    batch, seq, embedding_dim, fully_connected_dim = 2, 8, 32, 64
    x = jax.random.normal(kx, (batch, seq, embedding_dim), jnp.float32)
    w1, b1, w2, b2 = init_params(kp, embedding_dim, fully_connected_dim)
    ref = jnp.maximum(x @ w1 + b1, 0.0) @ w2 + b2

    # 1) Exact f32 compute path (tight tolerance).
    out_f32 = jax.block_until_ready(
        fully_connected(x, w1, b1, w2, b2, compute_dtype=jnp.float32))
    assert out_f32.shape == x.shape
    assert jnp.allclose(out_f32, ref, atol=1e-5, rtol=1e-5)

    # 2) Default bf16-compute path (f32 accumulation) — looser tolerance.
    out_bf16 = jax.block_until_ready(fully_connected(x, w1, b1, w2, b2))
    assert out_bf16.dtype == x.dtype
    assert jnp.allclose(out_bf16, ref, atol=5e-2, rtol=5e-2)

    # 3) Exercise multi-M-tile (non-divisible M), multi-F-tile and F padding:
    #    F=200 with tf=128 -> 2 F-tiles, weights zero-padded to F_pad=256.
    E2, F2 = 32, 200
    w1b, b1b, w2b, b2b = init_params(kp2, E2, F2)
    x_big = jax.random.normal(kx, (5, 123, E2), jnp.float32)
    ref_big = jnp.maximum(x_big @ w1b + b1b, 0.0) @ w2b + b2b
    out_big = jax.block_until_ready(
        fully_connected(x_big, w1b, b1b, w2b, b2b,
                        compute_dtype=jnp.float32, tm=64, tf=128))
    assert out_big.shape == x_big.shape
    assert jnp.allclose(out_big, ref_big, atol=1e-4, rtol=1e-4)

    print("KERNEL_OK")
</pallas_src>

<mosaic_0001>
module attributes {stable_mosaic.version = 11 : i64} {
  func.func @_ffn_kernel(%arg0: i32, %arg1: i32, %arg2: memref<16x32xf32, #tpu.memory_space<vmem>>, %arg3: memref<32x64xf32, #tpu.memory_space<vmem>>, %arg4: memref<1x64xf32, #tpu.memory_space<vmem>>, %arg5: memref<64x32xf32, #tpu.memory_space<vmem>>, %arg6: memref<1x32xf32, #tpu.memory_space<vmem>>, %arg7: memref<16x32xf32, #tpu.memory_space<vmem>>, %arg8: memref<16x32xf32, #tpu.memory_space<vmem>>) attributes {dimension_semantics = [#tpu.dimension_semantics<parallel>, #tpu.dimension_semantics<arbitrary>], iteration_bounds = array<i64: 1, 1>, scalar_prefetch = 0 : i64, scratch_operands = 1 : i64, tpu.core_type = #tpu.core_type<tc>, window_params = [{transform_indices = @transform_0, window_bounds = array<i64: 16, 32>}, {transform_indices = @transform_1, window_bounds = array<i64: 32, 64>}, {transform_indices = @transform_2, window_bounds = array<i64: 1, 64>}, {transform_indices = @transform_3, window_bounds = array<i64: 64, 32>}, {pipeline_mode = #tpu.pipeline_mode<synchronous>, transform_indices = @transform_4, window_bounds = array<i64: 1, 32>}, {transform_indices = @transform_5, window_bounds = array<i64: 16, 32>}]} {
    %c0_i32 = arith.constant 0 : i32
    %0 = arith.cmpi eq, %arg1, %c0_i32 : i32
    %1 = arith.extui %0 : i1 to i32
    %c0_i32_0 = arith.constant 0 : i32
    %2 = arith.cmpi ne, %1, %c0_i32_0 : i32
    scf.if %2 {
      %cst_16 = arith.constant 0.000000e+00 : f32
      %19 = vector.broadcast %cst_16 : f32 to vector<16x32xf32>
      %c0_17 = arith.constant 0 : index
      %c0_18 = arith.constant 0 : index
      %20 = vector.load %arg8[%c0_17, %c0_18] : memref<16x32xf32, #tpu.memory_space<vmem>>, vector<16x32xf32>
      tpu.vector_store %arg8[%c0_17, %c0_18], %19 {strides = array<i32>} : memref<16x32xf32, #tpu.memory_space<vmem>>, vector<16x32xf32>,
    } else {
    }
    %c0 = arith.constant 0 : index
    %c0_1 = arith.constant 0 : index
    %3 = vector.load %arg2[%c0, %c0_1] : memref<16x32xf32, #tpu.memory_space<vmem>>, vector<16x32xf32>
    %c0_2 = arith.constant 0 : index
    %c0_3 = arith.constant 0 : index
    %4 = vector.load %arg3[%c0_2, %c0_3] : memref<32x64xf32, #tpu.memory_space<vmem>>, vector<32x64xf32>
    %cst = arith.constant dense<0.000000e+00> : vector<16x64xf32>
    %5 = tpu.matmul %3, %4, %cst {dimension_numbers = #tpu.dot_dimension_numbers<[1], [0], [0], [1], [0, 0, 1, 1], [], []>} : vector<16x32xf32>, vector<32x64xf32>, vector<16x64xf32> -> vector<16x64xf32>
    %c0_4 = arith.constant 0 : index
    %c0_5 = arith.constant 0 : index
    %6 = vector.load %arg4[%c0_4, %c0_5] : memref<1x64xf32, #tpu.memory_space<vmem>>, vector<1x64xf32>
    %7 = vector.broadcast %6 : vector<1x64xf32> to vector<16x64xf32>
    %8 = arith.addf %5, %7 : vector<16x64xf32>
    %cst_6 = arith.constant 0.000000e+00 : f32
    %9 = vector.broadcast %cst_6 : f32 to vector<16x64xf32>
    %10 = arith.maximumf %8, %9 : vector<16x64xf32>
    %c0_7 = arith.constant 0 : index
    %c0_8 = arith.constant 0 : index
    %11 = vector.load %arg8[%c0_7, %c0_8] : memref<16x32xf32, #tpu.memory_space<vmem>>, vector<16x32xf32>
    %c0_9 = arith.constant 0 : index
    %c0_10 = arith.constant 0 : index
    %12 = vector.load %arg5[%c0_9, %c0_10] : memref<64x32xf32, #tpu.memory_space<vmem>>, vector<64x32xf32>
    %cst_11 = arith.constant dense<0.000000e+00> : vector<16x32xf32>
    %13 = tpu.matmul %10, %12, %cst_11 {dimension_numbers = #tpu.dot_dimension_numbers<[1], [0], [0], [1], [0, 0, 1, 1], [], []>} : vector<16x64xf32>, vector<64x32xf32>, vector<16x32xf32> -> vector<16x32xf32>
    %14 = arith.addf %11, %13 : vector<16x32xf32>
    %c0_12 = arith.constant 0 : index
    %c0_13 = arith.constant 0 : index
    %15 = vector.load %arg8[%c0_12, %c0_13] : memref<16x32xf32, #tpu.memory_space<vmem>>, vector<16x32xf32>
    tpu.vector_store %arg8[%c0_12, %c0_13], %14 {strides = array<i32>} : memref<16x32xf32, #tpu.memory_space<vmem>>, vector<16x32xf32>,
    %c0_i32_14 = arith.constant 0 : i32
    %16 = arith.cmpi eq, %arg1, %c0_i32_14 : i32
    %17 = arith.extui %16 : i1 to i32
    %c0_i32_15 = arith.constant 0 : i32
    %18 = arith.cmpi ne, %17, %c0_i32_15 : i32
    scf.if %18 {
      %c0_16 = arith.constant 0 : index
      %c0_17 = arith.constant 0 : index
      %19 = vector.load %arg8[%c0_16, %c0_17] : memref<16x32xf32, #tpu.memory_space<vmem>>, vector<16x32xf32>
      %c0_18 = arith.constant 0 : index
      %c0_19 = arith.constant 0 : index
      %20 = vector.load %arg6[%c0_18, %c0_19] : memref<1x32xf32, #tpu.memory_space<vmem>>, vector<1x32xf32>
      %21 = vector.broadcast %20 : vector<1x32xf32> to vector<16x32xf32>
      %22 = arith.addf %19, %21 : vector<16x32xf32>
      %c0_20 = arith.constant 0 : index
      %c0_21 = arith.constant 0 : index
      %23 = vector.load %arg7[%c0_20, %c0_21] : memref<16x32xf32, #tpu.memory_space<vmem>>, vector<16x32xf32>
      tpu.vector_store %arg7[%c0_20, %c0_21], %22 {strides = array<i32>} : memref<16x32xf32, #tpu.memory_space<vmem>>, vector<16x32xf32>,
    } else {
    }
    return
  }
  func.func @transform_0(%arg0: i32, %arg1: i32) -> (i32, i32) {
    %c0_i32 = arith.constant 0 : i32
    %c0_i32_0 = arith.constant 0 : i32
    return %arg0, %c0_i32 : i32, i32
  }
  func.func @transform_1(%arg0: i32, %arg1: i32) -> (i32, i32) {
    %c0_i32 = arith.constant 0 : i32
    %c0_i32_0 = arith.constant 0 : i32
    return %c0_i32, %arg1 : i32, i32
  }
  func.func @transform_2(%arg0: i32, %arg1: i32) -> (i32, i32) {
    %c0_i32 = arith.constant 0 : i32
    %c0_i32_0 = arith.constant 0 : i32
    return %c0_i32, %arg1 : i32, i32
  }
  func.func @transform_3(%arg0: i32, %arg1: i32) -> (i32, i32) {
    %c0_i32 = arith.constant 0 : i32
    %c0_i32_0 = arith.constant 0 : i32
    return %arg1, %c0_i32 : i32, i32
  }
  func.func @transform_4(%arg0: i32, %arg1: i32) -> (i32, i32) {
    %c0_i32 = arith.constant 0 : i32
    %c0_i32_0 = arith.constant 0 : i32
    %c0_i32_1 = arith.constant 0 : i32
    return %c0_i32, %c0_i32_0 : i32, i32
  }
  func.func @transform_5(%arg0: i32, %arg1: i32) -> (i32, i32) {
    %c0_i32 = arith.constant 0 : i32
    %c0_i32_0 = arith.constant 0 : i32
    return %arg0, %c0_i32 : i32, i32
  }
}

</mosaic_0001>

<bundles_post_ra>
// kernel: tpu_custom_call.1
= control target key start
LH: loop header
LB: loop body
LE: loop exit
PB: predicated region body
PF: predicated region fallthrough
CT: control target
= control target key end

     0   :  { %vm25_vm0 = vcmask 261120   ;;  %s459_s0 = inlined_call_operand.vmem [shape: f32[16,32], index: 0, kind: input, shape index: {}]   ;;  %s460_s1 = inlined_call_operand.vmem [shape: f32[32,64], index: 1, kind: input, shape index: {}]   ;;  %s461_s2 = inlined_call_operand.vmem [shape: f32[1,64], index: 2, kind: input, shape index: {}]   ;;  %s462_s3 = inlined_call_operand.vmem [shape: f32[64,32], index: 3, kind: input, shape index: {}]   ;;  %s463_s4 = inlined_call_operand.vmem [shape: f32[1,32], index: 4, kind: input, shape index: {}]   ;;  %s464_s5 = inlined_call_operand.hbm [shape: f32[16,32], index: 5, kind: output, shape index: {}]  }
   0x1   :  { %v30_v0 = vld [vmem:[%s460_s1] sm:$0xff]  ;;  %v31_v1 = vld [vmem:[%s460_s1 + $0x8] sm:$0xff]  ;;  %v32_v2 = vld [vmem:[%s460_s1 + $0x10] sm:$0xff] }
   0x2   :  { %v305_v3 = vpack.c.bf16 %v31_v1, %v30_v0  ;;  %v33_v4 = vld [vmem:[%s460_s1 + $0x18] sm:$0xff]  ;;  %v28_v5 = vld [vmem:[%s459_s0] sm:$0xff]  ;;  %v128_v8 = vld [vmem:[%s462_s3 + $0x8] sm:$0xff] }
   0x3   :  { %v309_v6 = vpack.c.bf16 %v33_v4, %v32_v2  ;;  %283 = vmatprep.mubr.msk.f32.mxu0 %vm25_vm0, %v28_v5  ;;  %v127_v7 = vld [vmem:[%s462_s3] sm:$0xff]  ;;  %v129_v9 = vld [vmem:[%s462_s3 + $0x10] sm:$0xff]  ;;  %v130_v11 = vld [vmem:[%s462_s3 + $0x18] sm:$0xff] }
   0x4   :  { %306 = vmatprep.subr.bf16.mxu0 %v305_v3  ;;  %v313_v10 = vpack.c.bf16 %v128_v8, %v127_v7  ;;  %v317_v12 = vpack.c.bf16 %v130_v11, %v129_v9  ;;  %v131_v13 = vld [vmem:[%s462_s3 + $0x20] sm:$0xff]  ;;  %v132_v14 = vld [vmem:[%s462_s3 + $0x28] sm:$0xff] }
   0x5   :  { %308 = vmatpush3.bf16.msra.mxu0 %v305_v3 }
   0x6   :  { %10 = vsyncpa [#allocation4], 0  ;;  %310 = vmatprep.subr.bf16.mxu0 %v309_v6  ;;  %314 = vmatprep.subr.bf16.mxu1 %v313_v10  ;;  %v321_v15 = vpack.c.bf16 %v132_v14, %v131_v13  ;;  %v29_v16 = vld [vmem:[%s459_s0 + $0x8] sm:$0xff]  ;;  %v133_v17 = vld [vmem:[%s462_s3 + $0x30] sm:$0xff]  ;;  %v357_v20 = vmov 0.0   ;;  %vm135_vm1 = vcmask 523264  }
   0x7   :  { %316 = vmatpush3.bf16.msra.mxu1 %v313_v10  ;;  %v134_v18 = vld [vmem:[%s462_s3 + $0x38] sm:$0xff]  ;;  %27 = vst.msk [vmem:[#allocation2 + $0x8] sm:$0xff] %vm25_vm0, %v357_v20  ;;  %26 = vst.msk [vmem:[#allocation2] sm:$0xff] %vm25_vm0, %v357_v20  ;;  %v253_v21 = vld [vmem:[%s461_s2] ss:$0 sm:$0xff]  ;;  %s358_s21 = smov [#allocation3]  }
   0x8   :  { %318 = vmatprep.subr.bf16.mxu1 %v317_v12  ;;  %v325_v19 = vpack.c.bf16 %v134_v18, %v133_v17  ;;  %v258_v34 = vld [vmem:[%s463_s4] ss:$0 sm:$0xff]  ;;  %s242_s22 = sshll.u32 %s358_s21, 4  ;;  %s243_s22 = int_to_ptr.vmem [resolvable:$true] %s242_s22 }
   0x9   :  { %312 = vmatpush3.bf16.msra.mxu0 %v309_v6  ;;  %s333_s23 = scalar_lea.vmem %s243_s22, 256  ;;  %p338_p1 = scmp.lt.s32.totalorder %s243_s22, %s243_s22 }
   0xa   :  { %p334_p0 = scmp.ne.s32.totalorder %s243_s22, %s333_s23  ;;  %p339_p2 = scmp.lt.s32.totalorder %s333_s23, %s333_s23 }
   0xb   :  { %320 = vmatpush3.bf16.msra.mxu1 %v317_v12 }
   0xc   :  { %284 = vmatmul.mubr.msk.f32.vlgmr.msra.gmra.mrb[0].mxu0 %vm25_vm0, %v29_v16  ;;  %322 = vmatprep.subr.bf16.mxu1 %v321_v15  ;;  %p340_p3 = por %p339_p2, %p338_p1 }
   0xe   :  { %v126_v28 = vld [vmem:[#allocation2 + $0x8] sm:$0xff]  ;;  %v125_v29 = vld [vmem:[#allocation2] sm:$0xff]  ;;  %p341_p4 = pnand %p340_p3, %p334_p0 }
   0xf   :  { %324 = vmatpush3.bf16.msra.mxu1 %v321_v15 }
  0x10   :  { %326 = vmatprep.subr.bf16.mxu1 %v325_v19 }
  0x13   :  { %328 = vmatpush3.bf16.msra.mxu1 %v325_v19 }
  0xdf   :  { %v285_v22 = vpop.f32.mrb[0].mxu0 }
  0xe0   :  { %v120_v23 = vadd.f32 %v285_v22, %v253_v21  ;;  %v114_v24 = vpop.f32.mrb[1].mxu0 }
  0xe1   :  { %v115_v25 = vadd.f32 %v253_v21, %v114_v24 }
  0xe2   :  { %v124_v27 = vmax.f32 %v120_v23, 0.0 }
  0xe3   :  { %v123_v26 = vmax.f32 %v115_v25, 0.0 }
  0xe5   :  { %302 = vmatprep.mubr.msk.f32.mxu1 %vm135_vm1, %v123_v26 }
  0xe6   :  { %303 = vmatmul.mubr.msk.f32.vlgmr.msra.gmra.mrb[0].mxu1 %vm135_vm1, %v124_v27 }
 0x1b9   :  { %v304_v30 = vpop.f32.mrb[0].mxu1 }
 0x1ba   :  { %v218_v31 = vadd.f32 %v304_v30, %v126_v28  ;;  %v208_v32 = vpop.f32.mrb[1].mxu1 }
 0x1bb   :  { %v217_v33 = vadd.f32 %v208_v32, %v125_v29 }
 0x1bc   :  { %220 = vst.msk [vmem:[#allocation2 + $0x8] sm:$0xff] %vm25_vm0, %v218_v31 }
 0x1bd   :  { %219 = vst.msk [vmem:[#allocation2] sm:$0xff] %vm25_vm0, %v217_v33 }
 0x1c3   :  { %v225_v35 = vld [vmem:[#allocation2 + $0x8] sm:$0xff] }
 0x1c4   :  { %v224_v36 = vld [vmem:[#allocation2] sm:$0xff]  ;;  %v234_v37 = vadd.f32 %v258_v34, %v225_v35 }
 0x1c5   :  { %v233_v38 = vadd.f32 %v258_v34, %v224_v36 }
 0x1c6   :  { %236 = vst.msk [vmem:[#allocation3 + $0x8] sm:$0xff] %vm25_vm0, %v234_v37 }
 0x1c7   :  { %235 = vst.msk [vmem:[#allocation3] sm:$0xff] %vm25_vm0, %v233_v38 }
 0x1c8   :  { %344 = shalt.err (!%p341_p4)
}
 0x1c9   :  { %s345_s25 = scalar_lea.hbm %s464_s5, 256 }
 0x1ca   :  { %p346_p5 = scmp.ne.s32.totalorder %s464_s5, %s345_s25  ;;  %p349_p6 = scmp.lt.u32.totalorder %s345_s25, %s464_s5 }
 0x1cc   :  { %p351_p7 = pnand %p349_p6, %p346_p5 }
 0x1ce   :  { %354 = shalt.err (!%p351_p7)
}
 0x1cf   :  { %s359_s30 = smov 128   ;;  %s360_s6 = smov 8  }
 0x1d0   :  { %248 = dma.vmem_to_hbm [thread:$0]  %s243_s22, 256, %s464_s5, [#allocation4], %s359_s30, %s359_s30, %s360_s6  }
 0x1d1   :  { %355 = dma.done.wait [#allocation4], 256  }
 0x1d2   :  { %356 = vsyncadd [#allocation4], 4294967040 }
 0x1d3   :  { %252 = vsyncpa [#allocation4], 1 }

</bundles_post_ra>
